<compile_context>
chip_gen: v7x
topology: tpu7x:2x2x1
jax: 0.10.0
libtpu: 0.0.40
codegen_flags: <defaults>
</compile_context>

<pallas_src>
import functools

import jax
import jax.numpy as jnp
from jax.experimental import pallas as pl
from jax.experimental.pallas import tpu as pltpu

LANES = 128
TARGET_TILE_BYTES = 512 * 1024   # per-input per-buffer target
MAX_TILE_ROWS_CAP = 2048         # keeps each (tile_rows,128) f32 temp <= 1 MiB


def _cdiv(a, b):
    return -(-a // b)


def _sublane_multiple(dtype):
    # f32 -> 8 sublanes, bf16 -> 16, int8/bool -> 32 (packed dtypes).
    return max(8, 32 // max(1, jnp.dtype(dtype).itemsize))


def _num_tensorcores():
    # Best-effort TensorCore-per-chip query; defaults to 1 (always correct,
    # just leaves the second v7x core idle if detection fails).
    try:
        info = pltpu.get_tpu_info()
        for name in ("num_cores", "core_count", "tensorcore_count",
                     "num_tensorcores", "tensor_cores_per_chip"):
            v = getattr(info, name, None)
            if isinstance(v, int) and v >= 1:
                return min(int(v), 2)
    except Exception:
        pass
    return 1


def _focal_loss_kernel(x_ref, y_ref, out_ref, *, alpha, gamma, tile_rows,
                       tiles_per_split, total, need_mask):
    j = pl.program_id(0)   # core / split axis
    i = pl.program_id(1)   # reduction (row-tile) axis

    @pl.when(i == 0)
    def _():
        out_ref[...] = jnp.zeros_like(out_ref)

    x = x_ref[...].astype(jnp.float32)
    y = y_ref[...].astype(jnp.float32)

    # Stable log-sigmoid pieces from a single shared exp(-|x|).
    z = jnp.exp(-jnp.abs(x))
    softplus_nabs = jnp.log1p(z)                        # log(1 + exp(-|x|))
    log_probs = jnp.minimum(x, 0.0) - softplus_nabs     # log(sigmoid(x))
    log_1_probs = jnp.minimum(-x, 0.0) - softplus_nabs  # log(1 - sigmoid(x))
    # sigmoid(x) = exp(log_sigmoid(x)): EUP exp instead of a VPU divide+select.
    probs = jnp.exp(log_probs)

    d = jnp.abs(y - probs)
    g = float(gamma)
    if g == int(g) and 1 <= int(g) <= 4:
        # Integer gamma: repeated multiplies (no log+exp from jnp.power).
        p = d
        for _ in range(int(g) - 1):
            p = p * d
        coeff = -p
    else:
        coeff = -jnp.power(d, jnp.float32(g))

    loss = (y * alpha) * log_probs + ((1.0 - y) * (1.0 - alpha)) * log_1_probs
    loss = loss * coeff

    def _accumulate(v):
        # Pure-VPU fold of the (tile_rows,128) loss into the resident,
        # lane-dense (1,8,128) accumulator block.
        partial = v.reshape(tile_rows // 8, 8, LANES).sum(axis=0)
        out_ref[...] += partial.reshape(1, 8, LANES)

    if need_mask:
        tile_start = (j * tiles_per_split + i) * (tile_rows * LANES)
        tile_end = tile_start + tile_rows * LANES

        @pl.when(tile_end <= total)           # interior tile: no mask cost
        def _():
            _accumulate(loss)

        @pl.when(tile_end > total)            # boundary / phantom tile only
        def _():
            rows_id = jax.lax.broadcasted_iota(jnp.int32, (tile_rows, LANES), 0)
            lanes_id = jax.lax.broadcasted_iota(jnp.int32, (tile_rows, LANES), 1)
            flat_idx = tile_start + rows_id * LANES + lanes_id
            _accumulate(jnp.where(flat_idx < total, loss, 0.0))
    else:
        _accumulate(loss)


def focal_loss(logits, label, *, alpha=0.25, gamma=2.0, reduction="mean"):
    assert logits.shape == label.shape
    total = int(logits.size)

    flat_x = logits.reshape(-1)
    flat_y = label.reshape(-1)

    rows = _cdiv(total, LANES)
    pad = rows * LANES - total
    if pad:
        # TODO(synk): padding costs an extra HBM read+write of both inputs;
        # a 1-D BlockSpec path would avoid it for ragged sizes.
        flat_x = jnp.pad(flat_x, (0, pad))
        flat_y = jnp.pad(flat_y, (0, pad))

    x2 = flat_x.reshape(rows, LANES)   # native dtypes; cast happens in-kernel
    y2 = flat_y.reshape(rows, LANES)

    num_splits = max(1, _num_tensorcores())
    align = max(_sublane_multiple(logits.dtype), _sublane_multiple(label.dtype))
    min_itemsize = min(jnp.dtype(logits.dtype).itemsize,
                       jnp.dtype(label.dtype).itemsize)
    max_tile_rows = min(MAX_TILE_ROWS_CAP,
                        max(align, TARGET_TILE_BYTES // (LANES * min_itemsize)))
    tile_rows = min(max_tile_rows,
                    _cdiv(_cdiv(rows, num_splits), align) * align)
    tiles_total = _cdiv(rows, tile_rows)
    num_splits = min(num_splits, tiles_total)
    tiles_per_split = _cdiv(tiles_total, num_splits)
    covered = num_splits * tiles_per_split * tile_rows * LANES
    need_mask = covered != total

    kernel = functools.partial(
        _focal_loss_kernel,
        alpha=float(alpha), gamma=float(gamma),
        tile_rows=tile_rows, tiles_per_split=tiles_per_split,
        total=total, need_mask=need_mask)

    # Clamp phantom-tile block indices (only possible when splits don't divide
    # tiles_total); the in-kernel mask zeroes their contribution.
    if num_splits * tiles_per_split > tiles_total:
        in_map = lambda j, i: (jnp.minimum(j * tiles_per_split + i,
                                           tiles_total - 1), 0)
    else:
        in_map = lambda j, i: (j * tiles_per_split + i, 0)

    itemsizes = (jnp.dtype(logits.dtype).itemsize
                 + jnp.dtype(label.dtype).itemsize)
    cost = pl.CostEstimate(
        flops=25 * total,
        transcendentals=3 * total,
        bytes_accessed=total * itemsizes + num_splits * 8 * LANES * 4,
    )

    def _run(split_sem):
        return pl.pallas_call(
            kernel,
            out_shape=jax.ShapeDtypeStruct((num_splits, 8, LANES), jnp.float32),
            grid_spec=pltpu.PrefetchScalarGridSpec(
                num_scalar_prefetch=0,
                grid=(num_splits, tiles_per_split),
                in_specs=[
                    pl.BlockSpec((tile_rows, LANES), in_map),
                    pl.BlockSpec((tile_rows, LANES), in_map),
                ],
                out_specs=pl.BlockSpec((1, 8, LANES), lambda j, i: (j, 0, 0)),
            ),
            compiler_params=pltpu.CompilerParams(
                dimension_semantics=(split_sem, "arbitrary")),
            cost_estimate=cost,
        )(x2, y2)

    if num_splits > 1:
        try:
            partials = _run(pltpu.CORE_PARALLEL)   # shard splits across TCs
        except Exception:
            partials = _run("parallel")            # fallback if unsupported
    else:
        partials = _run("arbitrary")

    total_sum = jnp.sum(partials)          # tiny (splits,8,128) reduce in XLA
    if reduction == "mean":
        return total_sum / jnp.float32(total)
    if reduction == "sum":
        return total_sum
    # TODO(synk): reduction='none' (full elementwise output) not implemented;
    # only the scalar reductions ('mean'/'sum') are supported here.
    raise NotImplementedError("reduction='none' not implemented")


def focal_loss_ref(logits, label, alpha=0.25, gamma=2.0):
    probs = jax.nn.sigmoid(logits)
    coeff = -(jnp.abs(label - probs) ** gamma)
    log_probs = jax.nn.log_sigmoid(logits)
    log_1_probs = jax.nn.log_sigmoid(-logits)
    loss = label * alpha * log_probs + (1.0 - label) * (1.0 - alpha) * log_1_probs
    return jnp.mean(loss * coeff)


if __name__ == "__main__":
    key = jax.random.PRNGKey(0)
    k1, k2 = jax.random.split(key)
    shape = (2, 4, 16, 16)  # N, C, H, W
    logits = jax.random.normal(k1, shape, dtype=jnp.float32)
    label = jax.random.bernoulli(k2, 0.5, shape).astype(jnp.float32)

    loss = focal_loss(logits, label)
    loss = jax.block_until_ready(loss)

    ref = focal_loss_ref(logits, label)
    assert jnp.allclose(loss, ref, rtol=1e-5, atol=1e-6), (loss, ref)
    print("KERNEL_OK")
</pallas_src>

<mosaic_0001>
module attributes {stable_mosaic.version = 11 : i64} {
  func.func @_focal_loss_kernel(%arg0: i32, %arg1: i32, %arg2: memref<16x128xf32, #tpu.memory_space<vmem>>, %arg3: memref<16x128xf32, #tpu.memory_space<vmem>>, %arg4: memref<1x8x128xf32, #tpu.memory_space<vmem>>) attributes {dimension_semantics = [#tpu.dimension_semantics<arbitrary>, #tpu.dimension_semantics<arbitrary>], iteration_bounds = array<i64: 1, 1>, scalar_prefetch = 0 : i64, scratch_operands = 0 : i64, tpu.core_type = #tpu.core_type<tc>, window_params = [{transform_indices = @transform_0, window_bounds = array<i64: 16, 128>}, {transform_indices = @transform_1, window_bounds = array<i64: 16, 128>}, {transform_indices = @transform_2, window_bounds = array<i64: 1, 8, 128>}]} {
    %c0_i32 = arith.constant 0 : i32
    %0 = arith.cmpi eq, %arg1, %c0_i32 : i32
    %1 = arith.extui %0 : i1 to i32
    %c0_i32_0 = arith.constant 0 : i32
    %2 = arith.cmpi ne, %1, %c0_i32_0 : i32
    scf.if %2 {
      %cst_18 = arith.constant 0.000000e+00 : f32
      %40 = vector.broadcast %cst_18 : f32 to vector<1x8x128xf32>
      %c0_19 = arith.constant 0 : index
      %c0_20 = arith.constant 0 : index
      %c0_21 = arith.constant 0 : index
      %41 = vector.load %arg4[%c0_19, %c0_20, %c0_21] : memref<1x8x128xf32, #tpu.memory_space<vmem>>, vector<1x8x128xf32>
      tpu.vector_store %arg4[%c0_19, %c0_20, %c0_21], %40 {strides = array<i32>} : memref<1x8x128xf32, #tpu.memory_space<vmem>>, vector<1x8x128xf32>,
    } else {
    }
    %c0 = arith.constant 0 : index
    %c0_1 = arith.constant 0 : index
    %3 = vector.load %arg2[%c0, %c0_1] : memref<16x128xf32, #tpu.memory_space<vmem>>, vector<16x128xf32>
    %c0_2 = arith.constant 0 : index
    %c0_3 = arith.constant 0 : index
    %4 = vector.load %arg3[%c0_2, %c0_3] : memref<16x128xf32, #tpu.memory_space<vmem>>, vector<16x128xf32>
    %5 = math.absf %3 : vector<16x128xf32>
    %cst = arith.constant 0.000000e+00 : f32
    %6 = vector.broadcast %cst : f32 to vector<16x128xf32>
    %7 = arith.subf %6, %5 : vector<16x128xf32>
    %8 = math.exp %7 : vector<16x128xf32>
    %9 = math.log1p %8 : vector<16x128xf32>
    %cst_4 = arith.constant 0.000000e+00 : f32
    %10 = vector.broadcast %cst_4 : f32 to vector<16x128xf32>
    %11 = arith.minimumf %3, %10 : vector<16x128xf32>
    %12 = arith.subf %11, %9 : vector<16x128xf32>
    %cst_5 = arith.constant 0.000000e+00 : f32
    %13 = vector.broadcast %cst_5 : f32 to vector<16x128xf32>
    %14 = arith.subf %13, %3 : vector<16x128xf32>
    %cst_6 = arith.constant 0.000000e+00 : f32
    %15 = vector.broadcast %cst_6 : f32 to vector<16x128xf32>
    %16 = arith.minimumf %14, %15 : vector<16x128xf32>
    %17 = arith.subf %16, %9 : vector<16x128xf32>
    %18 = math.exp %12 : vector<16x128xf32>
    %19 = arith.subf %4, %18 : vector<16x128xf32>
    %20 = math.absf %19 : vector<16x128xf32>
    %21 = arith.mulf %20, %20 : vector<16x128xf32>
    %cst_7 = arith.constant 0.000000e+00 : f32
    %22 = vector.broadcast %cst_7 : f32 to vector<16x128xf32>
    %23 = arith.subf %22, %21 : vector<16x128xf32>
    %cst_8 = arith.constant 2.500000e-01 : f32
    %24 = vector.broadcast %cst_8 : f32 to vector<16x128xf32>
    %25 = arith.mulf %4, %24 : vector<16x128xf32>
    %26 = arith.mulf %25, %12 : vector<16x128xf32>
    %cst_9 = arith.constant 1.000000e+00 : f32
    %27 = vector.broadcast %cst_9 : f32 to vector<16x128xf32>
    %28 = arith.subf %27, %4 : vector<16x128xf32>
    %cst_10 = arith.constant 7.500000e-01 : f32
    %29 = vector.broadcast %cst_10 : f32 to vector<16x128xf32>
    %30 = arith.mulf %28, %29 : vector<16x128xf32>
    %31 = arith.mulf %30, %17 : vector<16x128xf32>
    %32 = arith.addf %26, %31 : vector<16x128xf32>
    %33 = arith.mulf %32, %23 : vector<16x128xf32>
    %34 = vector.shape_cast %33 : vector<16x128xf32> to vector<2x8x128xf32>
    %cst_11 = arith.constant dense<0.000000e+00> : vector<8x128xf32>
    %35 = vector.multi_reduction <add>, %34, %cst_11 [0] : vector<2x8x128xf32> to vector<8x128xf32>
    %c0_12 = arith.constant 0 : index
    %c0_13 = arith.constant 0 : index
    %c0_14 = arith.constant 0 : index
    %36 = vector.load %arg4[%c0_12, %c0_13, %c0_14] : memref<1x8x128xf32, #tpu.memory_space<vmem>>, vector<1x8x128xf32>
    %37 = vector.shape_cast %35 : vector<8x128xf32> to vector<1x8x128xf32>
    %38 = arith.addf %36, %37 : vector<1x8x128xf32>
    %c0_15 = arith.constant 0 : index
    %c0_16 = arith.constant 0 : index
    %c0_17 = arith.constant 0 : index
    %39 = vector.load %arg4[%c0_15, %c0_16, %c0_17] : memref<1x8x128xf32, #tpu.memory_space<vmem>>, vector<1x8x128xf32>
    tpu.vector_store %arg4[%c0_15, %c0_16, %c0_17], %38 {strides = array<i32>} : memref<1x8x128xf32, #tpu.memory_space<vmem>>, vector<1x8x128xf32>,
    return
  }
  func.func @transform_0(%arg0: i32, %arg1: i32) -> (i32, i32) {
    %c1_i32 = arith.constant 1 : i32
    %0 = arith.muli %arg0, %c1_i32 : i32
    %1 = arith.addi %0, %arg1 : i32
    %c0_i32 = arith.constant 0 : i32
    %c0_i32_0 = arith.constant 0 : i32
    return %1, %c0_i32 : i32, i32
  }
  func.func @transform_1(%arg0: i32, %arg1: i32) -> (i32, i32) {
    %c1_i32 = arith.constant 1 : i32
    %0 = arith.muli %arg0, %c1_i32 : i32
    %1 = arith.addi %0, %arg1 : i32
    %c0_i32 = arith.constant 0 : i32
    %c0_i32_0 = arith.constant 0 : i32
    return %1, %c0_i32 : i32, i32
  }
  func.func @transform_2(%arg0: i32, %arg1: i32) -> (i32, i32, i32) {
    %c0_i32 = arith.constant 0 : i32
    %c0_i32_0 = arith.constant 0 : i32
    %c0_i32_1 = arith.constant 0 : i32
    return %arg0, %c0_i32, %c0_i32_0 : i32, i32, i32
  }
}

</mosaic_0001>

<bundles_post_ra>
// kernel: tpu_custom_call.1
= control target key start
LH: loop header
LB: loop body
LE: loop exit
PB: predicated region body
PF: predicated region fallthrough
CT: control target
= control target key end

     0   :  { %7 = vsyncpa [#allocation3], 0  ;;  %s289_s0 = inlined_call_operand.hbm [shape: f32[16,128], index: 0, kind: input, shape index: {}]   ;;  %s290_s1 = inlined_call_operand.hbm [shape: f32[16,128], index: 1, kind: input, shape index: {}]   ;;  %s291_s2 = inlined_call_operand.hbm [shape: f32[1,8,128], index: 2, kind: output, shape index: {}]  }
   0x1   :  { %8 = vsyncpa [#allocation6], 0 }
   0x2   :  { %9 = vsyncpa [#allocation4], 0  ;;  %s233_s9 = smov [#allocation2]   ;;  %s161_s13 = scalar_lea.hbm %s289_s0, 256 }
   0x3   :  { %s19_s10 = sshll.u32 %s233_s9, 4  ;;  %p162_p0 = scmp.ne.s32.totalorder %s289_s0, %s161_s13  ;;  %s20_s10 = int_to_ptr.vmem [resolvable:$true] %s19_s10 }
   0x4   :  { %p165_p1 = scmp.lt.u32.totalorder %s161_s13, %s289_s0 }
   0x6   :  { %p167_p2 = pnand %p165_p1, %p162_p0 }
   0x8   :  { %170 = shalt.err (!%p167_p2)
}
   0x9   :  { %s171_s18 = scalar_lea.vmem %s20_s10, 256  ;;  %p176_p4 = scmp.lt.s32.totalorder %s20_s10, %s20_s10 }
   0xa   :  { %p172_p3 = scmp.ne.s32.totalorder %s20_s10, %s171_s18  ;;  %p177_p5 = scmp.lt.s32.totalorder %s171_s18, %s171_s18 }
   0xc   :  { %p178_p6 = por %p177_p5, %p176_p4 }
   0xe   :  { %p179_p7 = pnand %p178_p6, %p172_p3 }
  0x10   :  { %182 = shalt.err (!%p179_p7)
}
  0x11   :  { %s234_s19 = smov 128   ;;  %s235_s20 = smov 8  }
  0x12   :  { %25 = dma.hbm_to_vmem [thread:$0]  %s289_s0, 256, %s20_s10, [#allocation3], %s234_s19, %s234_s19, %s235_s20  }
  0x13   :  { %s236_s23 = smov [#allocation5]   ;;  %s183_s27 = scalar_lea.hbm %s290_s1, 256 }
  0x14   :  { %s35_s24 = sshll.u32 %s236_s23, 4  ;;  %p184_p8 = scmp.ne.s32.totalorder %s290_s1, %s183_s27  ;;  %s36_s24 = int_to_ptr.vmem [resolvable:$true] %s35_s24 }
  0x15   :  { %p187_p9 = scmp.lt.u32.totalorder %s183_s27, %s290_s1 }
  0x17   :  { %p189_p10 = pnand %p187_p9, %p184_p8 }
  0x19   :  { %192 = shalt.err (!%p189_p10)
}
  0x1a   :  { %s193_s4 = scalar_lea.vmem %s36_s24, 256  ;;  %p198_p12 = scmp.lt.s32.totalorder %s36_s24, %s36_s24 }
  0x1b   :  { %p194_p11 = scmp.ne.s32.totalorder %s36_s24, %s193_s4  ;;  %p199_p13 = scmp.lt.s32.totalorder %s193_s4, %s193_s4 }
  0x1d   :  { %p200_p0 = por %p199_p13, %p198_p12 }
  0x1f   :  { %p201_p1 = pnand %p200_p0, %p194_p11 }
  0x21   :  { %204 = shalt.err (!%p201_p1)
}
  0x22   :  { %41 = dma.hbm_to_vmem [thread:$0]  %s290_s1, 256, %s36_s24, [#allocation6], %s234_s19, %s234_s19, %s235_s20  }
  0x23   :  { %227 = dma.done.wait [#allocation3], 256  }
  0x24   :  { %228 = vsyncadd [#allocation3], 4294967040 }
  0x25   :  { %229 = dma.done.wait [#allocation6], 256  }
  0x26   :  { %230 = vsyncadd [#allocation6], 4294967040  ;;  %v57_v0 = vld [vmem:[#allocation2] sm:$0xff]  ;;  %v58_v1 = vld [vmem:[#allocation2 + $0x8] sm:$0xff]  ;;  %s237_s1 = smov [#allocation7]  }
  0x27   :  { %v61_v2 = vand.u32 2147483647, %v57_v0  ;;  %v62_v3 = vand.u32 2147483647, %v58_v1  ;;  %v87_v21 = vmin.f32 %v57_v0, 0.0  ;;  %v88_v24 = vmin.f32 %v58_v1, 0.0 }
  0x28   :  { %v91_v31 = vsub.f32 0.0, %v57_v0  ;;  %v59_v33 = vld [vmem:[#allocation5] sm:$0xff]  ;;  %v92_v34 = vsub.f32 0.0, %v58_v1  ;;  %v60_v35 = vld [vmem:[#allocation5 + $0x8] sm:$0xff]  ;;  %s133_s6 = sshll.u32 %s237_s1, 4  ;;  %s134_s6 = int_to_ptr.vmem [resolvable:$true] %s133_s6 }
  0x29   :  { %v63_v4 = vsub.f32 0.0, %v61_v2  ;;  %v64_v5 = vsub.f32 0.0, %v62_v3  ;;  %v113_v37 = vsub.f32 1.0, %v59_v33  ;;  %v114_v39 = vsub.f32 1.0, %v60_v35  ;;  %s205_s7 = scalar_lea.vmem %s134_s6, 128  ;;  %p210_p3 = scmp.lt.s32.totalorder %s134_s6, %s134_s6 }
  0x2a   :  { %v93_v36 = vmin.f32 %v91_v31, 0.0  ;;  %v94_v38 = vmin.f32 %v92_v34, 0.0  ;;  %v109_v41 = vmul.f32 0.25, %v59_v33  ;;  %v110_v44 = vmul.f32 0.25, %v60_v35  ;;  %p206_p2 = scmp.ne.s32.totalorder %s134_s6, %s205_s7  ;;  %p211_p4 = scmp.lt.s32.totalorder %s205_s7, %s205_s7 }
  0x2b   :  { %v65_v6 = vmul.f32 1.442695, %v63_v4  ;;  %v67_v7 = vmul.f32 1.442695, %v64_v5  ;;  %v115_v42 = vmul.f32 0.75, %v113_v37  ;;  %v116_v45 = vmul.f32 0.75, %v114_v39 }
  0x2c   :  { %p212_p5 = por %p211_p4, %p210_p3 }
  0x2d   :  { %149 = vpow2.f32 %v65_v6 }
  0x2e   :  { %151 = vpow2.f32 %v67_v7  ;;  %p213_p6 = pnand %p212_p5, %p206_p2 }
  0x37   :  { %v150_v8 = vpop.eup %149 }
  0x38   :  { %v152_v9 = vpop.eup %151  ;;  %v69_v10 = vadd.f32 1.0, %v150_v8  ;;  %v72_v12 = vmul.f32 -0.5, %v150_v8  ;;  %v75_v15 = vand.u32 2147483647, %v150_v8 }
  0x39   :  { %v78_v11 = vadd.f32 1.0, %v152_v9  ;;  %v81_v13 = vmul.f32 -0.5, %v152_v9  ;;  %v84_v17 = vand.u32 2147483647, %v152_v9 }
  0x3a   :  { %153 = vlog2.f32 %v69_v10  ;;  %v73_v14 = vadd.f32 1.0, %v72_v12  ;;  %vm76_vm0 = vcmp.lt.f32.partialorder %v75_v15, 0.0004427343 }
  0x3b   :  { %155 = vlog2.f32 %v78_v11  ;;  %v82_v16 = vadd.f32 1.0, %v81_v13  ;;  %vm85_vm1 = vcmp.lt.f32.partialorder %v84_v17, 0.0004427343 }
  0x3c   :  { %v74_v18 = vmul.f32 %v150_v8, %v73_v14 }
  0x3d   :  { %v83_v20 = vmul.f32 %v152_v9, %v82_v16 }
  0x44   :  { %v154_v19 = vpop.eup %153 }
  0x45   :  { %v156_v22 = vpop.eup %155  ;;  %v71_v23 = vmul.f32 0.6931472, %v154_v19 }
  0x46   :  { %v80_v25 = vmul.f32 0.6931472, %v156_v22 }
  0x47   :  { %v77_v26 = vsel %vm76_vm0, %v74_v18, %v71_v23 }
  0x48   :  { %v86_v27 = vsel %vm85_vm1, %v83_v20, %v80_v25  ;;  %v89_v28 = vsub.f32 %v87_v21, %v77_v26  ;;  %v95_v40 = vsub.f32 %v93_v36, %v77_v26 }
  0x49   :  { %v90_v29 = vsub.f32 %v88_v24, %v86_v27  ;;  %v96_v43 = vsub.f32 %v94_v38, %v86_v27 }
  0x4a   :  { %v97_v30 = vmul.f32 1.442695, %v89_v28  ;;  %v111_v49 = vmul.f32 %v109_v41, %v89_v28  ;;  %v117_v50 = vmul.f32 %v115_v42, %v95_v40 }
  0x4b   :  { %v99_v32 = vmul.f32 1.442695, %v90_v29  ;;  %v112_v52 = vmul.f32 %v110_v44, %v90_v29  ;;  %v118_v53 = vmul.f32 %v116_v45, %v96_v43 }
  0x4c   :  { %157 = vpow2.f32 %v97_v30  ;;  %v119_v57 = vadd.f32 %v117_v50, %v111_v49 }
  0x4d   :  { %159 = vpow2.f32 %v99_v32  ;;  %v120_v59 = vadd.f32 %v118_v53, %v112_v52 }
  0x56   :  { %v158_v46 = vpop.eup %157 }
  0x57   :  { %v160_v47 = vpop.eup %159  ;;  %v101_v48 = vsub.f32 %v59_v33, %v158_v46 }
  0x58   :  { %v102_v51 = vsub.f32 %v60_v35, %v160_v47 }
  0x59   :  { %v103_v54 = vand.u32 2147483647, %v101_v48 }
  0x5a   :  { %v104_v55 = vand.u32 2147483647, %v102_v51 }
  0x5b   :  { %v105_v56 = vmul.f32 %v103_v54, %v103_v54 }
  0x5c   :  { %v106_v58 = vmul.f32 %v104_v55, %v104_v55 }
  0x5d   :  { %v107_v60 = vsub.f32 0.0, %v105_v56 }
  0x5e   :  { %v108_v61 = vsub.f32 0.0, %v106_v58 }
  0x5f   :  { %v121_v62 = vmul.f32 %v119_v57, %v107_v60 }
  0x60   :  { %v122_v63 = vmul.f32 %v120_v59, %v108_v61 }
  0x62   :  { %v123_v0 = vadd.f32 %v122_v63, %v121_v62 }
  0x64   :  { %126 = vst [vmem:[#allocation7] sm:$0xff] %v123_v0 }
  0x65   :  { %216 = shalt.err (!%p213_p6)
}
  0x66   :  { %s217_s10 = scalar_lea.hbm %s291_s2, 128 }
  0x67   :  { %p218_p7 = scmp.ne.s32.totalorder %s291_s2, %s217_s10  ;;  %p221_p8 = scmp.lt.u32.totalorder %s217_s10, %s291_s2 }
  0x69   :  { %p223_p9 = pnand %p221_p8, %p218_p7 }
  0x6b   :  { %226 = shalt.err (!%p223_p9)
}
  0x6c   :  { %136 = dma.vmem_to_hbm [thread:$0]  %s134_s6, 128, %s291_s2, [#allocation4]  }
  0x6d   :  { %231 = dma.done.wait [#allocation4], 128  }
  0x6e   :  { %232 = vsyncadd [#allocation4], 4294967168 }
  0x6f   :  { %140 = vsyncpa [#allocation3], 1 }
  0x70   :  { %141 = vsyncpa [#allocation6], 1 }
  0x71   :  { %142 = vsyncpa [#allocation4], 1 }

</bundles_post_ra>
